<compile_context>
chip_gen: v7x
topology: tpu7x:2x2x1
jax: 0.10.0
libtpu: 0.0.40
codegen_flags: <defaults>
</compile_context>

<pallas_src>
import jax
import jax.numpy as jnp
from jax import lax
from jax.experimental import pallas as pl
from jax.experimental.pallas import tpu as pltpu


def _round_up(x, m):
    return (x + m - 1) // m * m


def _choose_tm(B):
    """Batch tile: big (amortize ~0.35us/grid step), multiple of 8, and
    leaving >= 2 grid steps when the batch allows (v7x megacore sharding)."""
    tm = min(_round_up(B, 8), 512)
    if _round_up(B, tm) // tm >= 2:
        return tm
    if B >= 16:
        half = _round_up((B + 1) // 2, 8)
        if half < tm:
            return half
    return tm


def block2vec_kernel(idx_ref, emb_ref, wt_ref, b_ref, o_ref):
    # idx_ref: (tm, 1)      int32 token ids for this batch tile
    # emb_ref: (V_pad, D)   embedding table (matmul dtype, VMEM-resident)
    # wt_ref : (D, V_pad)   linear weight, pre-transposed (matmul dtype, resident)
    # b_ref  : (1, V_pad)   linear bias, f32 (padded lanes = -1e30)
    # o_ref  : (tm, V_pad)  log-probabilities (f32)
    ids = idx_ref[...]                                          # (tm, 1) i32
    tm = ids.shape[0]
    v_pad = emb_ref.shape[0]

    # Fused embedding gather on the MXU: one_hot(ids) @ table == table[ids].
    cols = lax.broadcasted_iota(jnp.int32, (tm, v_pad), 1)
    onehot = (cols == ids).astype(emb_ref.dtype)                # (tm, V_pad)
    embeds = jnp.dot(onehot, emb_ref[...],
                     preferred_element_type=jnp.float32)        # (tm, D) exact

    # Linear: plain (tm, D) @ (D, V_pad) matmul against the lane-dense,
    # pre-transposed weight; f32 accumulation + f32 bias.
    logits = jnp.dot(embeds.astype(wt_ref.dtype), wt_ref[...],
                     preferred_element_type=jnp.float32) + b_ref[...]

    # log_softmax over the vocab axis (torch dim=1), all in f32.
    m = jnp.max(logits, axis=-1, keepdims=True)
    shifted = logits - m
    lse = jnp.log(jnp.sum(jnp.exp(shifted), axis=-1, keepdims=True))
    o_ref[...] = (shifted - lse).astype(o_ref.dtype)


def block2vec_forward(inputs, emb_table, w, b, *, tm=None,
                      matmul_dtype=jnp.bfloat16, out_dtype=jnp.float32):
    """Forward pass matching the PyTorch Block2Vec module.

    inputs    : (B,) integer indices
    emb_table : (V, D) nn.Embedding weight
    w         : (V, D) nn.Linear weight (torch layout)
    b         : (V,)   nn.Linear bias
    returns   : (B, V) out_dtype log-probabilities (log_softmax over dim=1)
    """
    V, D = emb_table.shape
    assert w.shape == (V, D) and b.shape == (V,)
    B = int(inputs.shape[0])

    if tm is None:
        tm = _choose_tm(B)
    tm = min(_round_up(tm, 8), max(_round_up(B, 8), 8))
    B_pad = _round_up(B, tm)
    V_pad = _round_up(V, 128)

    # bf16 operands; bias / accumulation / softmax stay f32.
    emb_c = emb_table.astype(matmul_dtype)                      # (V, D)
    w_c = w.astype(matmul_dtype)                                # (V, D)
    b_p = b.astype(jnp.float32)
    if V_pad != V:
        emb_c = jnp.pad(emb_c, ((0, V_pad - V), (0, 0)))
        w_c = jnp.pad(w_c, ((0, V_pad - V), (0, 0)))
        # Padded vocab entries get a huge negative bias so exp() underflows
        # to 0 and they never affect the log-softmax of real entries.
        b_p = jnp.pad(b_p, (0, V_pad - V), constant_values=-1e30)
    w_t = w_c.T                                                 # (D, V_pad) lane-dense
    b_p = b_p.reshape(1, V_pad)

    ids = inputs.astype(jnp.int32)
    if B_pad != B:
        ids = jnp.pad(ids, (0, B_pad - B))
    ids2 = ids.reshape(B_pad, 1)

    # VMEM budget: double-buffered operands/out tile + f32 intermediates.
    msz = jnp.dtype(matmul_dtype).itemsize
    table_bytes = 2 * V_pad * D * msz                   # emb + w_t (resident)
    io_bytes = tm * 4 + V_pad * 4 + tm * V_pad * 4      # ids + bias + out tile
    interm = 3 * tm * V_pad * 4                         # onehot/logits/shifted
    est = 2 * (table_bytes + io_bytes) + interm
    vmem_limit = int(min(max(est + (8 << 20), 32 << 20), 64 << 20))

    grid = (B_pad // tm,)
    out = pl.pallas_call(
        block2vec_kernel,
        out_shape=jax.ShapeDtypeStruct((B_pad, V_pad), out_dtype),
        grid_spec=pltpu.PrefetchScalarGridSpec(
            num_scalar_prefetch=0,
            grid=grid,
            in_specs=[
                pl.BlockSpec((tm, 1), lambda i: (i, 0)),       # ids tile
                pl.BlockSpec((V_pad, D), lambda i: (0, 0)),    # emb table (resident)
                pl.BlockSpec((D, V_pad), lambda i: (0, 0)),    # weight^T (resident)
                pl.BlockSpec((1, V_pad), lambda i: (0, 0)),    # bias
            ],
            out_specs=pl.BlockSpec((tm, V_pad), lambda i: (i, 0)),
        ),
        compiler_params=pltpu.CompilerParams(
            dimension_semantics=("parallel",),
            vmem_limit_bytes=vmem_limit,
        ),
    )(ids2, emb_c, w_t, b_p)

    return out[:B, :V]


def reference_forward(inputs, emb_table, w, b, matmul_dtype=jnp.bfloat16):
    # Mirrors the kernel's operand quantization (bf16 operands, f32 math) so
    # the comparison is apples-to-apples.
    emb_q = emb_table.astype(matmul_dtype).astype(jnp.float32)
    w_q = w.astype(matmul_dtype).astype(jnp.float32)
    embeds = emb_q[inputs]
    logits = embeds @ w_q.T + b.astype(jnp.float32)
    return jax.nn.log_softmax(logits, axis=1)


if __name__ == "__main__":
    def run_case(name, V, D, B, key):
        k_emb, k_w, k_b, k_idx = jax.random.split(key, 4)
        emb_table = jax.random.normal(k_emb, (V, D), dtype=jnp.float32)
        w = jax.random.normal(k_w, (V, D), dtype=jnp.float32) * (1.0 / float(D) ** 0.5)
        b = jax.random.normal(k_b, (V,), dtype=jnp.float32) * 0.01
        inputs = jax.random.randint(k_idx, (B,), 0, V, dtype=jnp.int32)

        out = jax.block_until_ready(block2vec_forward(inputs, emb_table, w, b))
        ref = reference_forward(inputs, emb_table, w, b)
        assert out.shape == (B, V), f"{name}: bad shape {out.shape}"
        assert jnp.allclose(out, ref, atol=1e-4, rtol=1e-4), f"{name}: mismatch"

    key = jax.random.PRNGKey(0)
    k1, k2 = jax.random.split(key)
    # Lane-aligned case (V multiple of 128) and a padded case (V=200, B=20).
    run_case("aligned", V=128, D=32, B=16, key=k1)
    run_case("padded", V=200, D=32, B=20, key=k2)
    print("KERNEL_OK")
</pallas_src>

<mosaic_0001>
module attributes {stable_mosaic.version = 11 : i64} {
  func.func @block2vec_kernel(%arg0: i32, %arg1: memref<8x1xi32, #tpu.memory_space<vmem>>, %arg2: memref<128x32xbf16, #tpu.memory_space<vmem>>, %arg3: memref<32x128xbf16, #tpu.memory_space<vmem>>, %arg4: memref<1x128xf32, #tpu.memory_space<vmem>>, %arg5: memref<8x128xf32, #tpu.memory_space<vmem>>) attributes {dimension_semantics = [#tpu.dimension_semantics<parallel>], iteration_bounds = array<i64: 2>, scalar_prefetch = 0 : i64, scratch_operands = 0 : i64, tpu.core_type = #tpu.core_type<tc>, window_params = [{transform_indices = @transform_0, window_bounds = array<i64: 8, 1>}, {pipeline_mode = #tpu.pipeline_mode<synchronous>, transform_indices = @transform_1, window_bounds = array<i64: 128, 32>}, {pipeline_mode = #tpu.pipeline_mode<synchronous>, transform_indices = @transform_2, window_bounds = array<i64: 32, 128>}, {pipeline_mode = #tpu.pipeline_mode<synchronous>, transform_indices = @transform_3, window_bounds = array<i64: 1, 128>}, {transform_indices = @transform_4, window_bounds = array<i64: 8, 128>}]} {
    %c0 = arith.constant 0 : index
    %c0_0 = arith.constant 0 : index
    %0 = vector.load %arg1[%c0, %c0_0] : memref<8x1xi32, #tpu.memory_space<vmem>>, vector<8x1xi32>
    %1 = tpu.iota {dimensions = array<i32: 1>} : vector<8x128xi32>
    %2 = vector.broadcast %0 : vector<8x1xi32> to vector<8x128xi32>
    %3 = arith.cmpi eq, %1, %2 : vector<8x128xi32>
    %4 = arith.extui %3 : vector<8x128xi1> to vector<8x128xi32>
    %5 = arith.sitofp %4 : vector<8x128xi32> to vector<8x128xf32>
    %6 = arith.truncf %5 : vector<8x128xf32> to vector<8x128xbf16>
    %c0_1 = arith.constant 0 : index
    %c0_2 = arith.constant 0 : index
    %7 = vector.load %arg2[%c0_1, %c0_2] : memref<128x32xbf16, #tpu.memory_space<vmem>>, vector<128x32xbf16>
    %cst = arith.constant dense<0.000000e+00> : vector<8x32xf32>
    %8 = tpu.matmul %6, %7, %cst {dimension_numbers = #tpu.dot_dimension_numbers<[1], [0], [0], [1], [0, 0, 1, 1], [], []>} : vector<8x128xbf16>, vector<128x32xbf16>, vector<8x32xf32> -> vector<8x32xf32>
    %9 = arith.truncf %8 : vector<8x32xf32> to vector<8x32xbf16>
    %c0_3 = arith.constant 0 : index
    %c0_4 = arith.constant 0 : index
    %10 = vector.load %arg3[%c0_3, %c0_4] : memref<32x128xbf16, #tpu.memory_space<vmem>>, vector<32x128xbf16>
    %cst_5 = arith.constant dense<0.000000e+00> : vector<8x128xf32>
    %11 = tpu.matmul %9, %10, %cst_5 {dimension_numbers = #tpu.dot_dimension_numbers<[1], [0], [0], [1], [0, 0, 1, 1], [], []>} : vector<8x32xbf16>, vector<32x128xbf16>, vector<8x128xf32> -> vector<8x128xf32>
    %c0_6 = arith.constant 0 : index
    %c0_7 = arith.constant 0 : index
    %12 = vector.load %arg4[%c0_6, %c0_7] : memref<1x128xf32, #tpu.memory_space<vmem>>, vector<1x128xf32>
    %13 = vector.broadcast %12 : vector<1x128xf32> to vector<8x128xf32>
    %14 = arith.addf %11, %13 : vector<8x128xf32>
    %cst_8 = arith.constant dense<0xFF800000> : vector<8xf32>
    %15 = vector.multi_reduction <maximumf>, %14, %cst_8 [1] : vector<8x128xf32> to vector<8xf32>
    %16 = vector.shape_cast %15 : vector<8xf32> to vector<8x1xf32>
    %17 = vector.broadcast %16 : vector<8x1xf32> to vector<8x128xf32>
    %18 = arith.subf %14, %17 : vector<8x128xf32>
    %19 = math.exp %18 : vector<8x128xf32>
    %cst_9 = arith.constant dense<0.000000e+00> : vector<8xf32>
    %20 = vector.multi_reduction <add>, %19, %cst_9 [1] : vector<8x128xf32> to vector<8xf32>
    %21 = vector.shape_cast %20 : vector<8xf32> to vector<8x1xf32>
    %22 = math.log %21 : vector<8x1xf32>
    %23 = vector.broadcast %22 : vector<8x1xf32> to vector<8x128xf32>
    %24 = arith.subf %18, %23 : vector<8x128xf32>
    %c0_10 = arith.constant 0 : index
    %c0_11 = arith.constant 0 : index
    %25 = vector.load %arg5[%c0_10, %c0_11] : memref<8x128xf32, #tpu.memory_space<vmem>>, vector<8x128xf32>
    tpu.vector_store %arg5[%c0_10, %c0_11], %24 {strides = array<i32>} : memref<8x128xf32, #tpu.memory_space<vmem>>, vector<8x128xf32>,
    return
  }
  func.func @transform_0(%arg0: i32) -> (i32, i32) {
    %c0_i32 = arith.constant 0 : i32
    %c0_i32_0 = arith.constant 0 : i32
    return %arg0, %c0_i32 : i32, i32
  }
  func.func @transform_1(%arg0: i32) -> (i32, i32) {
    %c0_i32 = arith.constant 0 : i32
    %c0_i32_0 = arith.constant 0 : i32
    %c0_i32_1 = arith.constant 0 : i32
    return %c0_i32, %c0_i32_0 : i32, i32
  }
  func.func @transform_2(%arg0: i32) -> (i32, i32) {
    %c0_i32 = arith.constant 0 : i32
    %c0_i32_0 = arith.constant 0 : i32
    %c0_i32_1 = arith.constant 0 : i32
    return %c0_i32, %c0_i32_0 : i32, i32
  }
  func.func @transform_3(%arg0: i32) -> (i32, i32) {
    %c0_i32 = arith.constant 0 : i32
    %c0_i32_0 = arith.constant 0 : i32
    %c0_i32_1 = arith.constant 0 : i32
    return %c0_i32, %c0_i32_0 : i32, i32
  }
  func.func @transform_4(%arg0: i32) -> (i32, i32) {
    %c0_i32 = arith.constant 0 : i32
    %c0_i32_0 = arith.constant 0 : i32
    return %arg0, %c0_i32 : i32, i32
  }
}

</mosaic_0001>

<bundles_post_ra>
// kernel: tpu_custom_call.1
= control target key start
LH: loop header
LB: loop body
LE: loop exit
PB: predicated region body
PF: predicated region fallthrough
CT: control target
= control target key end

     0   :  { %9 = vsyncpa [#allocation3], 0  ;;  %s810_s0 = inlined_call_operand.vmem [shape: s32[16,1], index: 0, kind: input, shape index: {}]   ;;  %s811_s1 = inlined_call_operand.vmem [shape: bf16[128,32], index: 1, kind: input, shape index: {}]   ;;  %s812_s2 = inlined_call_operand.vmem [shape: bf16[32,128], index: 2, kind: input, shape index: {}]   ;;  %s813_s3 = inlined_call_operand.vmem [shape: f32[1,128], index: 3, kind: input, shape index: {}]   ;;  %s814_s4 = inlined_call_operand.hbm [shape: f32[16,128], index: 4, kind: output, shape index: {}]  }
   0x1   :  { %11 = vsyncpa [#allocation3 + $0x1], 0  ;;  %s677_s15 = smov 0   ;;  %s679_s16 = smov 0  }
   0x2   :  { %s681_s17 = smov 0   ;;  %s683_s18 = smov 0  }
   0x3 LB: > { %s698_s19 = sadd.s32 4294967295, %s645_s18   ;;  %s460_s20 = sadd.s32 4294967294, %s645_s18   ;;  %s645_s18 = sphi %s683_s18, %s820_s18   ;;  %s641_s17 = sphi %s681_s17, %s819_s17   ;;  %s637_s16 = sphi %s679_s16, %s818_s16   ;;  %s633_s15 = sphi %s677_s15, %s817_s15  }
   0x4   : > { %s702_s21 = sadd.s32 1, %s645_s18   ;;  %s113_s22 = sadd.s32 1, %s641_s17 }
   0x5   : > { %s110_s23 = ssub.s32 %s645_s18, %s702_s21  ;;  %p123_p0 = scmp.ne.s32.totalorder %s641_s17, %s637_s16 }
   0x6   : > { %p111_p1 = scmp.eq.s32.totalorder %s110_s23, 0  ;;  %p124_p2 = scmp.eq.s32.totalorder %s698_s19, 1 }
   0x7   : > { %p129_p3 = scmp.ne.s32.totalorder %s637_s16, %s633_s15  ;;  %p130_p4 = scmp.eq.s32.totalorder %s460_s20, 1 }
   0x8   : > { %s713_s24 = scalar_select %p111_p1, %s641_s17, %s113_s22  }
   0x9   : > { %p715_p5 = por %p124_p2, %p123_p0  ;;  %p719_p6 = por %p130_p4, %p129_p3 }
   0xa   : > { %p463_p7 = scmp.ge.s32.totalorder %s645_s18, 1  ;;  %p164_p8 = scmp.lt.s32.totalorder %s645_s18, 3 }
   0xc   : > { %p165_p9 = pnand %p463_p7, %p164_p8 }
   0xd   : > { %p189_p10 = scmp.lt.s32.totalorder (!%p165_p9), %s698_s19, 1  ;;  %v569_v0 = vld [vmem:[%s811_s1] sm:$0xff] (!%p165_p9)   ;;  %v647_v1 = vmov (!%p165_p9), 0   ;;  %v648_v2 = vmov (!%p165_p9), 0.0   ;;  %v570_v3 = vld [vmem:[%s811_s1 + $0x8] sm:$0xff] (!%p165_p9)   ;;  %v571_v5 = vld [vmem:[%s811_s1 + $0x10] sm:$0xff] (!%p165_p9)   ;;  %v195_v12 = vlaneseq (!%p165_p9) }
   0xe   : > { %168 = sbr.rel (%p165_p9) target bundleno = 912 (0x390), region = 36  ;;  %568 = vset.pattern.permute.xlu0 (!%p165_p9), %v647_v1  ;;  %497 = vmatprep.subr.bf16.mxu0 (!%p165_p9), %v648_v2  ;;  %vm649_vm0 = vmmov (!%p165_p9), 0   ;;  %v577_v6 = vld [vmem:[%s812_s2] sm:$0xff] (!%p165_p9)   ;;  %v572_v7 = vld [vmem:[%s811_s1 + $0x18] sm:$0xff] (!%p165_p9)   ;;  %v574_v9 = vld [vmem:[%s811_s1 + $0x28] sm:$0xff] (!%p165_p9)   ;;  %vm332_vm3 = vcmask (!%p165_p9), 261120  }
   0xf   : > { %498 = vmatpush3.bf16.msra.mxu0 (!%p165_p9), %v569_v0  ;;  %517 = vmatprep.subr.bf16.mxu1 (!%p165_p9), %v648_v2  ;;  %v573_v8 = vld [vmem:[%s811_s1 + $0x20] sm:$0xff] (!%p165_p9)   ;;  %v575_v10 = vld [vmem:[%s811_s1 + $0x30] sm:$0xff] (!%p165_p9)   ;;  %v576_v11 = vld [vmem:[%s811_s1 + $0x38] sm:$0xff] (!%p165_p9)   ;;  %v196_v13 = vand.u32 (!%p165_p9), 127, %v195_v12  ;;  %v650_v15 = vmov (!%p165_p9), 1.0|1.0  }
  0x10   : > { %499 = vmatprep.subr.bf16.mxu0 (!%p165_p9), %v648_v2  ;;  %513 = vmatprep.mubr.msk.bf16.mxu0 (!%p165_p9), %vm649_vm0, %v648_v2  ;;  %v578_v16 = vld [vmem:[%s812_s2 + $0x8] sm:$0xff] (!%p165_p9)   ;;  %v477_v22 = vld [vmem:[%s813_s3] ss:$0 sm:$0xff] (!%p165_p9)  ;;  %s186_s11 = sand.u32 (!%p165_p9), 1, %s637_s16   ;;  %s482_s13 = sshll.u32 (!%p165_p9), %s698_s19, 7 }
  0x11   : > { %521 = vmatprep.mubr.msk.bf16.mxu1 (!%p165_p9), %vm649_vm0, %v648_v2  ;;  %518 = vmatpush3.bf16.msra.mxu1 (!%p165_p9), %v577_v6  ;;  %s464_s12 = sshll.u32 (!%p165_p9), %s186_s11, 3  ;;  %s768_s27 = scalar_lea.hbm (!%p165_p9), %s814_s4, %s482_s13 }
  0x12   : > { %519 = vmatprep.subr.bf16.mxu1 (!%p165_p9), %v648_v2  ;;  %s188_s14 = scalar_lea.vmem (!%p165_p9), [#allocation2], %s464_s12  ;;  %s388_s28 = scalar_lea.sflag (!%p165_p9), [#allocation3], %s186_s11 }
  0x13   : > { %500 = vmatpush3.bf16.msra.mxu0 (!%p165_p9), %v570_v3  ;;  %s401_s20 = sshll.u32 (!%p165_p9), %s188_s14, 4  ;;  %s770_s20 = int_to_ptr.vmem [resolvable:$true] %s401_s20 }
  0x14   : > { %501 = vmatprep.subr.bf16.mxu0 (!%p165_p9), %v648_v2 }
  0x15   : > { %s190_s29 = scalar_select %p189_p10, %s698_s19, 1  ;;  %520 = vmatpush3.bf16.msra.mxu1 %v578_v16 }
  0x16   : > { %s651_s19 = smov [#allocation2]  }
  0x17   : > { %s465_s6 = sshll.u32 %s190_s29, 3  ;;  %502 = vmatpush3.bf16.msra.mxu0 %v571_v5  ;;  %s583_s29 = scalar_lea.vmem %s770_s20, 128 }
  0x18   : > { %s192_s9 = scalar_lea.vmem %s810_s0, %s465_s6  ;;  %503 = vmatprep.subr.bf16.mxu0 %v648_v2  ;;  %p584_p11 = scmp.ne.s32.totalorder %s770_s20, %s583_s29 }
  0x19   : > { %v194_v4 = vld [vmem:[%s192_s9] sm:$0xff]  ;;  %s587_s30 = sshll.u32 %s651_s19, 4  ;;  %s588_s30 = int_to_ptr.vmem [resolvable:$false] %s587_s30 }
  0x1a   : > { %198 = vperm.xlu0 %568, %v194_v4   ;;  %p585_p12 = pnand %p584_p11, %p715_p5  ;;  %s589_s5 = scalar_lea.vmem %s588_s30, 256 }
  0x1b   : > { %504 = vmatpush3.bf16.msra.mxu0 %v572_v7  ;;  %p590_p0 = scmp.lt.s32.totalorder %s770_s20, %s588_s30  ;;  %p591_p1 = scmp.lt.s32.totalorder %s589_s5, %s583_s29 }
  0x1c   : > { %505 = vmatprep.subr.bf16.mxu0 %v648_v2  ;;  %p586_p13 = pneg %p585_p12 }
  0x1d   : > { %p592_p2 = por %p591_p1, %p590_p0 }
  0x1f   : > { %506 = vmatpush3.bf16.msra.mxu0 %v573_v8  ;;  %p593_p3 = pnand %p592_p2, %p586_p13 }
  0x20   : > { %507 = vmatprep.subr.bf16.mxu0 %v648_v2 }
  0x23   : > { %508 = vmatpush3.bf16.msra.mxu0 %v574_v9 }
  0x24   : > { %509 = vmatprep.subr.bf16.mxu0 %v648_v2 }
  0x27   : > { %510 = vmatpush3.bf16.msra.mxu0 %v575_v10 }
  0x28   : > { %511 = vmatprep.subr.bf16.mxu0 %v648_v2 }
  0x2b   : > { %512 = vmatpush3.bf16.msra.mxu0 %v576_v11 }
  0x99   : > { %v199_v14 = vpop.permute.xlu0 %198 }
  0x9a   : > { %vm200_vm1 = vcmp.eq.s32.totalorder %v196_v13, %v199_v14 }
  0x9b   : > { %vm475_vm2 = vmpackc.low %vm200_vm1, %vm200_vm1 }
  0x9c   : > { %514 = vmatmul.mubr.msk.bf16.vlgmr.msra.gmra.mrb[0].mxu0 %vm475_vm2, %v650_v15 }
 0x16f   : > { %v302_v17 = vpop.f32.mrb[0].mxu0 }
 0x170   : > { %v308_v18 = vpack.c.bf16 %v302_v17, %v302_v17  ;;  %v515_v19 = vpop.f32.mrb[1].mxu0 }
 0x171   : > { %v305_v20 = vpop.f32.mrb[2].mxu0 }
 0x172   : > { %v516_v21 = vpop.f32.mrb[3].mxu0  ;;  %522 = vmatmul.mubr.msk.bf16.vlgmr.msra.gmra.mrb[0].mxu1 %vm332_vm3, %v308_v18 }
 0x245   : > { %v370_v23 = vpop.f32.mrb[0].mxu1 }
 0x246   : > { %v371_v24 = vadd.f32 %v477_v22, %v370_v23  ;;  %v523_v25 = vpop.f32.mrb[1].mxu1 }
 0x247   : > { %v373_v26 = vpop.f32.mrb[2].mxu1 }
 0x248   : > { %376 = vmax.xlane.f32.xlu0 %v371_v24  ;;  %v524_v27 = vpop.f32.mrb[3].mxu1 }
 0x2d5   : > { %v377_v28 = vpop.xlane.xlu0 %376 }
 0x2d6   : > { %v378_v29 = vsub.f32 %v371_v24, %v377_v28 }
 0x2d8   : > { %v379_v30 = vmul.f32 1.442695, %v378_v29 }
 0x2da   : > { %579 = vpow2.f32 %v379_v30 }
 0x2e4   : > { %v580_v31 = vpop.eup %579 }
 0x2e5   : > { %381 = vadd.xlane.f32.xlu1 %v580_v31 }
 0x372   : > { %v382_v32 = vpop.xlane.xlu1 %381 }
 0x373   : > { %581 = vlog2.f32 %v382_v32 }
 0x37d   : > { %v582_v33 = vpop.eup %581 }
 0x37e   : > { %v384_v34 = vmul.f32 0.6931472, %v582_v33 }
 0x380   : > { %v385_v35 = vsub.f32 %v378_v29, %v384_v34 }
 0x382   : > { %386 = vst [vmem:[%s188_s14] sm:$0xff] %v385_v35 }
 0x383   : > { %596 = shalt.err (!%p593_p3)
}
 0x384   : > { %s597_s6 = scalar_lea.hbm %s768_s27, 128  ;;  %s601_s9 = scalar_lea.hbm %s814_s4, 256 }
 0x385   : > { %p598_p4 = scmp.ne.s32.totalorder %s768_s27, %s597_s6  ;;  %p602_p9 = scmp.lt.u32.totalorder %s768_s27, %s814_s4 }
 0x386   : > { %p603_p10 = scmp.lt.u32.totalorder %s601_s9, %s597_s6  ;;  %p605_p12 = scmp.lt.u32.totalorder %s597_s6, %s768_s27 }
 0x387   : > { %p599_p7 = pnand %p598_p4, %p715_p5 }
 0x388   : > { %p604_p11 = por %p603_p10, %p602_p9 }
 0x389   : > { %p600_p8 = pneg %p599_p7 }
 0x38a   : > { %p606_p13 = por %p605_p12, %p604_p11 }
 0x38c   : > { %p607_p0 = pnand %p606_p13, %p600_p8 }
 0x38e   : > { %610 = shalt.err (!%p607_p0)
}
 0x38f   : > { %525 = dma.vmem_to_hbm [thread:$0]  (%p715_p5), %s770_s20, 128, %s768_s27, %s388_s28  }
 0x390 PF: > { %p531_p1 = scmp.ge.s32.totalorder %s645_s18, 2  ;;  %s413_s12 = sand.u32 1, %s633_s15  }
 0x391   : > { %s414_s13 = scalar_lea.sflag [#allocation3], %s413_s12 }
 0x392   : > { %p528_p2 = pnand %p531_p1, %p719_p6 }
 0x394   : > { %628 = dma.done.wait (!%p528_p2), %s414_s13, 128  }
 0x395   : > { %630 = vsyncadd (!%p528_p2), %s414_s13, 4294967168  ;;  %p14_p3 = scmp.ge.s32.totalorder %s702_s21, 4   ;;  %s817_s15 = smov %s637_s16 }
 0x396   : > { %s818_s16 = smov %s641_s17  ;;  %s819_s17 = smov %s713_s24 }
 0x397   : > { %s820_s18 = smov %s702_s21  ;;  %16 = sbr.rel (!%p14_p3) target bundleno = 3 (0x3), region = 71 }
 0x39e   :  { %419 = vsyncpa [#allocation3], 1 }
 0x39f   :  { %421 = vsyncpa [#allocation3 + $0x1], 1 }

</bundles_post_ra>
